<compile_context>
chip_gen: v5e
topology: v5e:2x2
jax: 0.10.0
libtpu: 0.0.40
codegen_flags: <defaults>
</compile_context>

<pallas_src>
import math
import jax
import jax.numpy as jnp
from jax.experimental import pallas as pl
from jax.experimental.pallas import tpu as pltpu


LANE = 128      # lane width  (last dim)
SUBLANE = 8     # sublane width (second-to-last dim)


def _round_up(x, m):
    return (x + m - 1) // m * m


def _pad2d(a, rows, cols):
    return jnp.pad(a, ((0, rows - a.shape[0]), (0, cols - a.shape[1])))


def _vmem_capacity_bytes():
    """Physical VMEM per core; 64 MiB fallback (safe even on v7x)."""
    try:
        return int(pltpu.get_tpu_info().vmem_capacity_bytes)
    except Exception:
        return 64 * 1024 * 1024


# ---------------------------------------------------------------------------
# Fused forward kernel (layer count is static per architecture)
# ---------------------------------------------------------------------------

def _make_fused_kernel(num_hidden):
    """Grid (batch_tiles, k_tiles).  Per grid step:
         acc += x_tile @ Wpw_tile            (bf16 x bf16 -> f32 accumulate)
       at the last K step:
         h = relu(acc); hidden Linear+ReLU layers; output Linear; store."""

    n_in = 4 + 2 * num_hidden  # x, w_pw, (w_i, b_i)*H, w_out, b_out

    def kernel(*refs):
        x_ref, w_pw_ref = refs[0], refs[1]
        o_ref = refs[n_in]
        acc_ref = refs[n_in + 1]

        k = pl.program_id(1)

        @pl.when(k == 0)
        def _init():
            acc_ref[...] = jnp.zeros_like(acc_ref)

        # Pathways layer (mask already folded into the weight), K-chunk.
        acc_ref[...] += jnp.dot(x_ref[...], w_pw_ref[...],
                                preferred_element_type=jnp.float32)

        @pl.when(k == pl.num_programs(1) - 1)
        def _finish():
            h = jnp.maximum(acc_ref[...], 0.0)            # f32 activations
            idx = 2
            for _ in range(num_hidden):
                w_ref, b_ref = refs[idx], refs[idx + 1]
                idx += 2
                h = jnp.maximum(
                    jnp.dot(h.astype(jnp.bfloat16), w_ref[...],
                            preferred_element_type=jnp.float32)
                    + b_ref[...],                         # (1, N) f32 bias
                    0.0)
            w_out_ref, b_out_ref = refs[idx], refs[idx + 1]
            o_ref[...] = (
                jnp.dot(h.astype(jnp.bfloat16), w_out_ref[...],
                        preferred_element_type=jnp.float32)
                + b_out_ref[...]).astype(o_ref.dtype)

    return kernel


# ---------------------------------------------------------------------------
# Parameter init (mirrors the PyTorch module's shapes/init) and preparation
# ---------------------------------------------------------------------------

def init_params(key, n_genes, architecture):
    keys = jax.random.split(key, 2 + 2 * len(architecture))
    k_iter = iter(keys)

    # Binary pathway membership matrix (stand-in for pathways_df).
    pathways_mask = jax.random.bernoulli(
        next(k_iter), p=0.3, shape=(n_genes, architecture[0])
    ).astype(jnp.float32)

    # kaiming_uniform_(a=sqrt(5)) bound = 1/sqrt(fan_in)
    bound_pw = 1.0 / math.sqrt(n_genes)
    pathways_weight = jax.random.uniform(
        next(k_iter), (n_genes, architecture[0]),
        minval=-bound_pw, maxval=bound_pw, dtype=jnp.float32)

    linears = []
    current = architecture[0]
    for i in range(1, len(architecture) - 1):
        out = architecture[i]
        bound = 1.0 / math.sqrt(current)
        w = jax.random.uniform(next(k_iter), (current, out),
                               minval=-bound, maxval=bound, dtype=jnp.float32)
        b = jax.random.uniform(next(k_iter), (1, out),
                               minval=-bound, maxval=bound, dtype=jnp.float32)
        linears.append((w, b))
        current = out

    out_dim = architecture[-1]
    bound = 1.0 / math.sqrt(current)
    w_out = jax.random.uniform(next(k_iter), (current, out_dim),
                               minval=-bound, maxval=bound, dtype=jnp.float32)
    b_out = jax.random.uniform(next(k_iter), (1, out_dim),
                               minval=-bound, maxval=bound, dtype=jnp.float32)

    return {
        "pathways_mask": pathways_mask,
        "pathways_weight": pathways_weight,
        "linears": linears,
        "output": (w_out, b_out),
    }


def prepare_fused_params(params):
    """One-time prep: fold the binary mask into the pathway weight, zero-pad
    every weight/bias feature dim to the 128-lane boundary (exact), and store
    the weights in bf16 (MXU operands); biases stay f32 (added post-MXU)."""
    masked = params["pathways_mask"] * params["pathways_weight"]   # in f32

    layer_ws = [masked] + [w for (w, _) in params["linears"]] + [params["output"][0]]
    layer_bs = [None] + [b for (_, b) in params["linears"]] + [params["output"][1]]

    padded_ws, padded_bs = [], []
    for w, b in zip(layer_ws, layer_bs):
        kdim, ndim = w.shape
        kp, np_ = _round_up(kdim, LANE), _round_up(ndim, LANE)
        padded_ws.append(_pad2d(w, kp, np_).astype(jnp.bfloat16))
        padded_bs.append(None if b is None else
                         _pad2d(b, 1, np_).astype(jnp.float32))

    return {
        "weights": padded_ws,       # padded (K_pad, N_pad) bf16 per layer
        "biases": padded_bs,        # padded (1, N_pad) f32 (None for pathways)
        "in_dim": masked.shape[0],
        "out_dim": layer_ws[-1].shape[1],
    }


# ---------------------------------------------------------------------------
# Forward pass: one fused pallas_call, (batch, K)-tiled grid
# ---------------------------------------------------------------------------

def neural_network_forward(prepared, x, *, batch_tile=None, max_k_tile=None):
    batch, n_genes = x.shape
    assert n_genes == prepared["in_dim"]

    weights, biases = prepared["weights"], prepared["biases"]
    num_hidden = len(weights) - 2
    k_pad, n_pw_pad = weights[0].shape
    out_pad = weights[-1].shape[1]
    n_max_pad = max(w.shape[1] for w in weights)

    # --- VMEM budget (per core) -----------------------------------------
    capacity = _vmem_capacity_bytes()
    budget = min(int(capacity * 0.6), 96 * 1024 * 1024)

    # Resident, single-buffered bytes: hidden/output weights + biases.
    resident = sum(int(w.size) * w.dtype.itemsize for w in weights[1:])
    resident += sum(int(b.size) * b.dtype.itemsize for b in biases[1:])

    # --- K tile for the pathways weight: multiple of 128 lanes, divides
    # k_pad, double-buffered tile within ~1/3 of the budget. --------------
    tk_cap = k_pad if max_k_tile is None else max(LANE, _round_up(max_k_tile, LANE))
    tk = LANE
    for cand in range(LANE, k_pad + 1, LANE):
        if (k_pad % cand == 0 and cand <= tk_cap
                and 2 * cand * n_pw_pad * 2 <= budget // 3):
            tk = cand
    nk = k_pad // tk
    pw_bufs = 1 if nk == 1 else 2
    pw_bytes = pw_bufs * tk * n_pw_pad * 2

    # --- Batch tile from the remaining budget ----------------------------
    per_row = (2 * tk * 2             # double-buffered bf16 x tile
               + 2 * out_pad * 4      # double-buffered f32 output tile
               + n_pw_pad * 4         # f32 accumulator scratch
               + 2 * n_max_pad * 4)   # live f32 activations (headroom)
    avail = max(budget - resident - pw_bytes, 256 * 1024)
    tb_cap = max(SUBLANE, (avail // per_row) // SUBLANE * SUBLANE)
    tb_cap = min(tb_cap, 1024)
    if batch_tile is not None:
        tb_cap = min(tb_cap, max(SUBLANE, _round_up(batch_tile, SUBLANE)))

    batch_sub = _round_up(batch, SUBLANE)
    tb = min(tb_cap, batch_sub)
    # Prefer >= 2 batch steps so the "parallel" axis can split across both
    # TensorCores on v7x (harmless elsewhere: per-step cost ~0.35 us).
    if batch_sub >= 2 * SUBLANE and batch_sub // tb < 2:
        tb = _round_up((batch_sub + 1) // 2, SUBLANE)
    batch_pad = _round_up(batch_sub, tb)
    nb = batch_pad // tb

    x_pad = _pad2d(x, batch_pad, k_pad).astype(jnp.bfloat16)

    # --- BlockSpecs -------------------------------------------------------
    invariant = pl.Buffered(1)   # grid-invariant operands: fetch exactly once
    in_specs = [
        pl.BlockSpec((tb, tk), lambda i, k: (i, k)),                  # x
        pl.BlockSpec((tk, n_pw_pad), lambda i, k: (k, 0),             # Wpw
                     pipeline_mode=(invariant if nk == 1 else pl.Buffered(2))),
    ]
    inputs = [x_pad, weights[0]]
    for w, b in zip(weights[1:], biases[1:]):
        inputs.append(w)
        in_specs.append(pl.BlockSpec(w.shape, lambda i, k: (0, 0),
                                     pipeline_mode=invariant))
        inputs.append(b)
        in_specs.append(pl.BlockSpec(b.shape, lambda i, k: (0, 0),
                                     pipeline_mode=invariant))
    out_spec = pl.BlockSpec((tb, out_pad), lambda i, k: (i, 0))

    # --- Explicit VMEM limit + cost estimate ------------------------------
    needed = (resident + pw_bytes
              + 2 * tb * tk * 2            # x tile
              + 2 * tb * out_pad * 4       # output tile
              + tb * n_pw_pad * 4          # accumulator scratch
              + 2 * tb * n_max_pad * 4)    # live activations
    vmem_limit = int(min(capacity, max(needed * 5 // 4 + (2 << 20), 16 << 20)))

    flops = 2 * batch_pad * sum(int(w.shape[0]) * int(w.shape[1]) for w in weights)
    bytes_accessed = (int(x_pad.size) * 2
                      + nb * int(weights[0].size) * 2
                      + sum(int(w.size) * 2 for w in weights[1:])
                      + sum(int(b.size) * 4 for b in biases[1:])
                      + batch_pad * out_pad * 4)
    cost = pl.CostEstimate(flops=int(flops), transcendentals=0,
                           bytes_accessed=int(bytes_accessed))

    out_padded = pl.pallas_call(
        _make_fused_kernel(num_hidden),
        out_shape=jax.ShapeDtypeStruct((batch_pad, out_pad), jnp.float32),
        grid_spec=pltpu.PrefetchScalarGridSpec(
            num_scalar_prefetch=0,
            grid=(nb, nk),
            in_specs=in_specs,
            out_specs=out_spec,
            scratch_shapes=[pltpu.VMEM((tb, n_pw_pad), jnp.float32)]),
        compiler_params=pltpu.CompilerParams(
            dimension_semantics=("parallel", "arbitrary"),
            vmem_limit_bytes=vmem_limit),
        cost_estimate=cost,
    )(*inputs)

    # Slice padded rows / lanes back to the logical output.
    return out_padded[:batch, :prepared["out_dim"]]


# ---------------------------------------------------------------------------
# Pure-JAX (f32) reference
# ---------------------------------------------------------------------------

def reference_forward(params, x):
    h = jnp.maximum(x @ (params["pathways_mask"] * params["pathways_weight"]), 0.0)
    for (w, b) in params["linears"]:
        h = jnp.maximum(h @ w + b, 0.0)
    w_out, b_out = params["output"]
    return h @ w_out + b_out


if __name__ == "__main__":
    key = jax.random.PRNGKey(0)
    k_params, k_x, k2_params, k2_x = jax.random.split(key, 4)

    # --- Case 1: small model, fully-resident pathways weight (K grid = 1) --
    #   batch=8, 32 genes, architecture [16, 32, 8]:
    #   pathways 32->16 (ReLU), Linear(16,32)+ReLU, Linear(32,8)
    batch, n_genes, architecture = 8, 32, [16, 32, 8]
    params = init_params(k_params, n_genes, architecture)
    x = jax.random.normal(k_x, (batch, n_genes), dtype=jnp.float32)

    prepared = prepare_fused_params(params)     # done once, not per forward
    out = jax.block_until_ready(neural_network_forward(prepared, x))
    ref = reference_forward(params, x)
    assert out.shape == (batch, architecture[-1])
    # bf16 MXU operands with f32 accumulation => loosened tolerance vs f32 ref.
    assert jnp.allclose(out, ref, atol=5e-2, rtol=5e-2), (
        "mismatch vs reference (case 1), max abs err = "
        f"{float(jnp.max(jnp.abs(out - ref)))}")

    # --- Case 2: force the K-tiled pathways path and >1 batch tile ---------
    # (small shapes, but exercises the accumulate-over-K grid axis that kicks
    # in automatically for large gene counts / tight VMEM).
    batch2, n_genes2, architecture2 = 24, 300, [16, 32, 8]
    params2 = init_params(k2_params, n_genes2, architecture2)
    x2 = jax.random.normal(k2_x, (batch2, n_genes2), dtype=jnp.float32)

    prepared2 = prepare_fused_params(params2)
    out2 = jax.block_until_ready(
        neural_network_forward(prepared2, x2, max_k_tile=128))
    ref2 = reference_forward(params2, x2)
    assert out2.shape == (batch2, architecture2[-1])
    assert jnp.allclose(out2, ref2, atol=5e-2, rtol=5e-2), (
        "mismatch vs reference (case 2), max abs err = "
        f"{float(jnp.max(jnp.abs(out2 - ref2)))}")

    print("KERNEL_OK")
</pallas_src>

<mosaic_0001>
module attributes {stable_mosaic.version = 11 : i64} {
  func.func @kernel(%arg0: i32, %arg1: i32, %arg2: memref<8x128xbf16, #tpu.memory_space<vmem>>, %arg3: memref<128x128xbf16, #tpu.memory_space<vmem>>, %arg4: memref<128x128xbf16, #tpu.memory_space<vmem>>, %arg5: memref<1x128xf32, #tpu.memory_space<vmem>>, %arg6: memref<128x128xbf16, #tpu.memory_space<vmem>>, %arg7: memref<1x128xf32, #tpu.memory_space<vmem>>, %arg8: memref<8x128xf32, #tpu.memory_space<vmem>>, %arg9: memref<8x128xf32, #tpu.memory_space<vmem>>) attributes {dimension_semantics = [#tpu.dimension_semantics<parallel>, #tpu.dimension_semantics<arbitrary>], iteration_bounds = array<i64: 1, 1>, scalar_prefetch = 0 : i64, scratch_operands = 1 : i64, tpu.core_type = #tpu.core_type<tc>, window_params = [{transform_indices = @transform_0, window_bounds = array<i64: 8, 128>}, {pipeline_mode = #tpu.pipeline_mode<synchronous>, transform_indices = @transform_1, window_bounds = array<i64: 128, 128>}, {pipeline_mode = #tpu.pipeline_mode<synchronous>, transform_indices = @transform_2, window_bounds = array<i64: 128, 128>}, {pipeline_mode = #tpu.pipeline_mode<synchronous>, transform_indices = @transform_3, window_bounds = array<i64: 1, 128>}, {pipeline_mode = #tpu.pipeline_mode<synchronous>, transform_indices = @transform_4, window_bounds = array<i64: 128, 128>}, {pipeline_mode = #tpu.pipeline_mode<synchronous>, transform_indices = @transform_5, window_bounds = array<i64: 1, 128>}, {transform_indices = @transform_6, window_bounds = array<i64: 8, 128>}]} {
    %c0_i32 = arith.constant 0 : i32
    %0 = arith.cmpi eq, %arg1, %c0_i32 : i32
    %1 = arith.extui %0 : i1 to i32
    %c0_i32_0 = arith.constant 0 : i32
    %2 = arith.cmpi ne, %1, %c0_i32_0 : i32
    scf.if %2 {
      %cst_10 = arith.constant 0.000000e+00 : f32
      %12 = vector.broadcast %cst_10 : f32 to vector<8x128xf32>
      %c0_11 = arith.constant 0 : index
      %c0_12 = arith.constant 0 : index
      %13 = vector.load %arg9[%c0_11, %c0_12] : memref<8x128xf32, #tpu.memory_space<vmem>>, vector<8x128xf32>
      tpu.vector_store %arg9[%c0_11, %c0_12], %12 {strides = array<i32>} : memref<8x128xf32, #tpu.memory_space<vmem>>, vector<8x128xf32>,
    } else {
    }
    %c0 = arith.constant 0 : index
    %c0_1 = arith.constant 0 : index
    %3 = vector.load %arg9[%c0, %c0_1] : memref<8x128xf32, #tpu.memory_space<vmem>>, vector<8x128xf32>
    %c0_2 = arith.constant 0 : index
    %c0_3 = arith.constant 0 : index
    %4 = vector.load %arg2[%c0_2, %c0_3] : memref<8x128xbf16, #tpu.memory_space<vmem>>, vector<8x128xbf16>
    %c0_4 = arith.constant 0 : index
    %c0_5 = arith.constant 0 : index
    %5 = vector.load %arg3[%c0_4, %c0_5] : memref<128x128xbf16, #tpu.memory_space<vmem>>, vector<128x128xbf16>
    %cst = arith.constant dense<0.000000e+00> : vector<8x128xf32>
    %6 = tpu.matmul %4, %5, %cst {dimension_numbers = #tpu.dot_dimension_numbers<[1], [0], [0], [1], [0, 0, 1, 1], [], []>} : vector<8x128xbf16>, vector<128x128xbf16>, vector<8x128xf32> -> vector<8x128xf32>
    %7 = arith.addf %3, %6 : vector<8x128xf32>
    %c0_6 = arith.constant 0 : index
    %c0_7 = arith.constant 0 : index
    %8 = vector.load %arg9[%c0_6, %c0_7] : memref<8x128xf32, #tpu.memory_space<vmem>>, vector<8x128xf32>
    tpu.vector_store %arg9[%c0_6, %c0_7], %7 {strides = array<i32>} : memref<8x128xf32, #tpu.memory_space<vmem>>, vector<8x128xf32>,
    %c0_i32_8 = arith.constant 0 : i32
    %9 = arith.cmpi eq, %arg1, %c0_i32_8 : i32
    %10 = arith.extui %9 : i1 to i32
    %c0_i32_9 = arith.constant 0 : i32
    %11 = arith.cmpi ne, %10, %c0_i32_9 : i32
    scf.if %11 {
      %c0_10 = arith.constant 0 : index
      %c0_11 = arith.constant 0 : index
      %12 = vector.load %arg9[%c0_10, %c0_11] : memref<8x128xf32, #tpu.memory_space<vmem>>, vector<8x128xf32>
      %cst_12 = arith.constant 0.000000e+00 : f32
      %13 = vector.broadcast %cst_12 : f32 to vector<8x128xf32>
      %14 = arith.maximumf %12, %13 : vector<8x128xf32>
      %15 = arith.truncf %14 : vector<8x128xf32> to vector<8x128xbf16>
      %c0_13 = arith.constant 0 : index
      %c0_14 = arith.constant 0 : index
      %16 = vector.load %arg4[%c0_13, %c0_14] : memref<128x128xbf16, #tpu.memory_space<vmem>>, vector<128x128xbf16>
      %cst_15 = arith.constant dense<0.000000e+00> : vector<8x128xf32>
      %17 = tpu.matmul %15, %16, %cst_15 {dimension_numbers = #tpu.dot_dimension_numbers<[1], [0], [0], [1], [0, 0, 1, 1], [], []>} : vector<8x128xbf16>, vector<128x128xbf16>, vector<8x128xf32> -> vector<8x128xf32>
      %c0_16 = arith.constant 0 : index
      %c0_17 = arith.constant 0 : index
      %18 = vector.load %arg5[%c0_16, %c0_17] : memref<1x128xf32, #tpu.memory_space<vmem>>, vector<1x128xf32>
      %19 = vector.broadcast %18 : vector<1x128xf32> to vector<8x128xf32>
      %20 = arith.addf %17, %19 : vector<8x128xf32>
      %cst_18 = arith.constant 0.000000e+00 : f32
      %21 = vector.broadcast %cst_18 : f32 to vector<8x128xf32>
      %22 = arith.maximumf %20, %21 : vector<8x128xf32>
      %23 = arith.truncf %22 : vector<8x128xf32> to vector<8x128xbf16>
      %c0_19 = arith.constant 0 : index
      %c0_20 = arith.constant 0 : index
      %24 = vector.load %arg6[%c0_19, %c0_20] : memref<128x128xbf16, #tpu.memory_space<vmem>>, vector<128x128xbf16>
      %cst_21 = arith.constant dense<0.000000e+00> : vector<8x128xf32>
      %25 = tpu.matmul %23, %24, %cst_21 {dimension_numbers = #tpu.dot_dimension_numbers<[1], [0], [0], [1], [0, 0, 1, 1], [], []>} : vector<8x128xbf16>, vector<128x128xbf16>, vector<8x128xf32> -> vector<8x128xf32>
      %c0_22 = arith.constant 0 : index
      %c0_23 = arith.constant 0 : index
      %26 = vector.load %arg7[%c0_22, %c0_23] : memref<1x128xf32, #tpu.memory_space<vmem>>, vector<1x128xf32>
      %27 = vector.broadcast %26 : vector<1x128xf32> to vector<8x128xf32>
      %28 = arith.addf %25, %27 : vector<8x128xf32>
      %c0_24 = arith.constant 0 : index
      %c0_25 = arith.constant 0 : index
      %29 = vector.load %arg8[%c0_24, %c0_25] : memref<8x128xf32, #tpu.memory_space<vmem>>, vector<8x128xf32>
      tpu.vector_store %arg8[%c0_24, %c0_25], %28 {strides = array<i32>} : memref<8x128xf32, #tpu.memory_space<vmem>>, vector<8x128xf32>,
    } else {
    }
    return
  }
  func.func @transform_0(%arg0: i32, %arg1: i32) -> (i32, i32) {
    %c0_i32 = arith.constant 0 : i32
    return %arg0, %arg1 : i32, i32
  }
  func.func @transform_1(%arg0: i32, %arg1: i32) -> (i32, i32) {
    %c0_i32 = arith.constant 0 : i32
    %c0_i32_0 = arith.constant 0 : i32
    return %arg1, %c0_i32 : i32, i32
  }
  func.func @transform_2(%arg0: i32, %arg1: i32) -> (i32, i32) {
    %c0_i32 = arith.constant 0 : i32
    %c0_i32_0 = arith.constant 0 : i32
    %c0_i32_1 = arith.constant 0 : i32
    return %c0_i32, %c0_i32_0 : i32, i32
  }
  func.func @transform_3(%arg0: i32, %arg1: i32) -> (i32, i32) {
    %c0_i32 = arith.constant 0 : i32
    %c0_i32_0 = arith.constant 0 : i32
    %c0_i32_1 = arith.constant 0 : i32
    return %c0_i32, %c0_i32_0 : i32, i32
  }
  func.func @transform_4(%arg0: i32, %arg1: i32) -> (i32, i32) {
    %c0_i32 = arith.constant 0 : i32
    %c0_i32_0 = arith.constant 0 : i32
    %c0_i32_1 = arith.constant 0 : i32
    return %c0_i32, %c0_i32_0 : i32, i32
  }
  func.func @transform_5(%arg0: i32, %arg1: i32) -> (i32, i32) {
    %c0_i32 = arith.constant 0 : i32
    %c0_i32_0 = arith.constant 0 : i32
    %c0_i32_1 = arith.constant 0 : i32
    return %c0_i32, %c0_i32_0 : i32, i32
  }
  func.func @transform_6(%arg0: i32, %arg1: i32) -> (i32, i32) {
    %c0_i32 = arith.constant 0 : i32
    %c0_i32_0 = arith.constant 0 : i32
    return %arg0, %c0_i32 : i32, i32
  }
}

</mosaic_0001>

<bundles_post_ra>
// kernel: tpu_custom_call.1
= control target key start
LH: loop header
LB: loop body
LE: loop exit
PB: predicated region body
PF: predicated region fallthrough
CT: control target
= control target key end

     0   :  { %11 = vsyncpa [#allocation4], 0  ;;  %s681_s0 = inlined_call_operand.hbm [shape: bf16[8,128], index: 0, kind: input, shape index: {}]   ;;  %s682_s1 = inlined_call_operand.hbm [shape: bf16[128,128], index: 1, kind: input, shape index: {}]   ;;  %s683_s2 = inlined_call_operand.hbm [shape: bf16[128,128], index: 2, kind: input, shape index: {}]   ;;  %s684_s3 = inlined_call_operand.vmem [shape: f32[1,128], index: 3, kind: input, shape index: {}]   ;;  %s685_s4 = inlined_call_operand.hbm [shape: bf16[128,128], index: 4, kind: input, shape index: {}]   ;;  %s686_s5 = inlined_call_operand.vmem [shape: f32[1,128], index: 5, kind: input, shape index: {}]   ;;  %s687_s6 = inlined_call_operand.hbm [shape: f32[8,128], index: 6, kind: output, shape index: {}]  }
   0x1   :  { %12 = vsyncpa [#allocation7], 0 }
   0x2   :  { %13 = vsyncpa [#allocation10], 0  ;;  %s30_s23 = sshll.u32 %s682_s1, 4  ;;  %s31_s23 = int_to_ptr.hbm [resolvable:$true] %s30_s23 }
   0x3   :  { %14 = vsyncpa [#allocation5], 0  ;;  %s618_s24 = smov [#allocation6]   ;;  %s20_s28 = sshll.u32 %s681_s0, 4  ;;  %s21_s28 = int_to_ptr.hbm [resolvable:$true] %s20_s28 }
   0x4   :  { %s32_s25 = sshll.u32 %s618_s24, 4  ;;  %s619_s29 = smov 64   ;;  %s33_s25 = int_to_ptr.vmem [resolvable:$true] %s32_s25 }
   0x5   :  { %s620_s30 = smov 4   ;;  %s621_s7 = smov [#allocation3]  }
   0x6   :  { %38 = dma.hbm_to_vmem [thread:$0]  %s31_s23, 1024, %s33_s25, [#allocation7], %s619_s29, %s619_s29, %s620_s30  }
   0x7   :  { %s22_s8 = sshll.u32 %s621_s7, 4  ;;  %s43_s11 = sshll.u32 %s683_s2, 4  ;;  %s23_s8 = int_to_ptr.vmem [resolvable:$true] %s22_s8  ;;  %s44_s11 = int_to_ptr.hbm [resolvable:$true] %s43_s11 }
   0x8   :  { %25 = dma.hbm_to_vmem [thread:$0]  %s21_s28, 64, %s23_s8, [#allocation4]  }
   0x9   :  { %s58_s13 = sshll.u32 %s685_s4, 4  ;;  %s622_s14 = smov [#allocation8]   ;;  %s59_s13 = int_to_ptr.hbm [resolvable:$true] %s58_s13 }
   0xa   :  { %s45_s15 = sshll.u32 %s622_s14, 4  ;;  %s623_s0 = smov [#allocation9]   ;;  %s46_s15 = int_to_ptr.vmem [resolvable:$true] %s45_s15 }
   0xb   :  { %51 = dma.hbm_to_vmem [thread:$0]  %s44_s11, 1024, %s46_s15, [#allocation7], %s619_s29, %s619_s29, %s620_s30  }
   0xc   :  { %s60_s16 = sshll.u32 %s623_s0, 4  ;;  %s61_s16 = int_to_ptr.vmem [resolvable:$true] %s60_s16 }
   0xd   :  { %66 = dma.hbm_to_vmem [thread:$0]  %s59_s13, 1024, %s61_s16, [#allocation10], %s619_s29, %s619_s29, %s620_s30  }
   0xe   :  { %610 = dma.done.wait [#allocation4], 64  }
   0xf   :  { %611 = vsyncadd [#allocation4], 4294967232 }
  0x10   :  { %612 = dma.done.wait [#allocation7], 2048  }
  0x11   :  { %613 = vsyncadd [#allocation7], 4294965248 }
  0x12   :  { %614 = dma.done.wait [#allocation10], 1024  }
  0x13   :  { %615 = vsyncadd [#allocation10], 4294966272  ;;  %v464_v0 = vld [vmem:[#allocation6 + $0x38] sm:$0xff]  ;;  %v463_v1 = vld [vmem:[#allocation6 + $0x30] sm:$0xff]  ;;  %s624_s19 = smov [#allocation11]   ;;  %s349_s23 = sshll.u32 %s687_s6, 4  ;;  %s350_s23 = int_to_ptr.hbm [resolvable:$true] %s349_s23 }
  0x14   :  { %156 = vmatpush.bf16.msra.mxu0 %v464_v0  ;;  %v472_v2 = vld [vmem:[#allocation8 + $0x38] sm:$0xff]  ;;  %v471_v3 = vld [vmem:[#allocation8 + $0x30] sm:$0xff]  ;;  %v462_v4 = vld [vmem:[#allocation6 + $0x28] sm:$0xff]  ;;  %s347_s20 = sshll.u32 %s624_s19, 4  ;;  %s348_s20 = int_to_ptr.vmem [resolvable:$true] %s347_s20 }
  0x15   :  { %245 = vmatpush.bf16.msra.mxu1 %v472_v2  ;;  %v470_v5 = vld [vmem:[#allocation8 + $0x28] sm:$0xff]  ;;  %v461_v6 = vld [vmem:[#allocation6 + $0x20] sm:$0xff]  ;;  %v460_v8 = vld [vmem:[#allocation6 + $0x18] sm:$0xff] }
  0x16   :  { %v469_v7 = vld [vmem:[#allocation8 + $0x20] sm:$0xff]  ;;  %v468_v9 = vld [vmem:[#allocation8 + $0x18] sm:$0xff]  ;;  %v459_v10 = vld [vmem:[#allocation6 + $0x10] sm:$0xff] }
  0x17   :  { %v467_v11 = vld [vmem:[#allocation8 + $0x10] sm:$0xff]  ;;  %v458_v12 = vld [vmem:[#allocation6 + $0x8] sm:$0xff]  ;;  %v457_v14 = vld [vmem:[#allocation6] sm:$0xff] }
  0x18   :  { %157 = vmatpush.bf16.msra.mxu0 %v463_v1  ;;  %v466_v13 = vld [vmem:[#allocation8 + $0x8] sm:$0xff]  ;;  %v91_v15 = vld [vmem:[#allocation3] sm:$0xf]  ;;  %v465_v16 = vld [vmem:[#allocation8] sm:$0xff] }
  0x19   :  { %246 = vmatpush.bf16.msra.mxu1 %v471_v3  ;;  %v480_v17 = vld [vmem:[#allocation9 + $0x38] sm:$0xff]  ;;  %v479_v18 = vld [vmem:[#allocation9 + $0x30] sm:$0xff]  ;;  %v478_v19 = vld [vmem:[#allocation9 + $0x28] sm:$0xff] }
  0x1a   :  { %328 = vmatpush.bf16.msra.mxu2 %v480_v17  ;;  %v477_v20 = vld [vmem:[#allocation9 + $0x20] sm:$0xff]  ;;  %v476_v21 = vld [vmem:[#allocation9 + $0x18] sm:$0xff]  ;;  %v475_v22 = vld [vmem:[#allocation9 + $0x10] sm:$0xff] }
  0x1b   :  { %v474_v27 = vld [vmem:[#allocation9 + $0x8] sm:$0xff]  ;;  %v473_v28 = vld [vmem:[#allocation9] sm:$0xff]  ;;  %v488_v29 = vld [vmem:[%s684_s3] ss:$0 sm:$0xff] }
  0x1c   :  { %158 = vmatpush.bf16.msra.mxu0 %v462_v4  ;;  %v489_v35 = vld [vmem:[%s686_s5] ss:$0 sm:$0xff] }
  0x1d   :  { %247 = vmatpush.bf16.msra.mxu1 %v470_v5 }
  0x1e   :  { %329 = vmatpush.bf16.msra.mxu2 %v479_v18 }
  0x20   :  { %159 = vmatpush.bf16.msra.mxu0 %v461_v6 }
  0x21   :  { %248 = vmatpush.bf16.msra.mxu1 %v469_v7 }
  0x22   :  { %330 = vmatpush.bf16.msra.mxu2 %v478_v19 }
  0x24   :  { %160 = vmatpush.bf16.msra.mxu0 %v460_v8 }
  0x25   :  { %249 = vmatpush.bf16.msra.mxu1 %v468_v9 }
  0x26   :  { %331 = vmatpush.bf16.msra.mxu2 %v477_v20 }
  0x28   :  { %161 = vmatpush.bf16.msra.mxu0 %v459_v10 }
  0x29   :  { %250 = vmatpush.bf16.msra.mxu1 %v467_v11 }
  0x2a   :  { %332 = vmatpush.bf16.msra.mxu2 %v476_v21 }
  0x2c   :  { %162 = vmatpush.bf16.msra.mxu0 %v458_v12 }
  0x2d   :  { %251 = vmatpush.bf16.msra.mxu1 %v466_v13 }
  0x2e   :  { %333 = vmatpush.bf16.msra.mxu2 %v475_v22 }
  0x30   :  { %163 = vmatpush.bf16.msra.mxu0 %v457_v14 }
  0x31   :  { %252 = vmatpush.bf16.msra.mxu1 %v465_v16 }
  0x32   :  { %334 = vmatpush.bf16.msra.mxu2 %v474_v27 }
  0x33   :  { %164 = vmatmul.bf16.vlgmr.msra.gmra.mxu0 %v91_v15 }
  0x36   :  { %335 = vmatpush.bf16.msra.mxu2 %v473_v28 }
  0xb0   :  { %v165_v23 = vpop.f32.mrf.mxu0 }
  0xb1   :  { %v175_v24 = vmax.f32 %v165_v23, 0.0 }
  0xb3   :  { %v176_v25 = vpack.c.bf16 %v175_v24, %v175_v24 }
  0xb5   :  { %253 = vmatmul.bf16.vlgmr.msra.gmra.mxu1 %v176_v25 }
  0xb8   :  { %v167_v26 = vpop.f32.mrf.mxu0 }
 0x132   :  { %v254_v30 = vpop.f32.mrf.mxu1 }
 0x133   :  { %v255_v31 = vadd.f32 %v488_v29, %v254_v30 }
 0x135   :  { %v258_v32 = vmax.f32 %v255_v31, 0.0 }
 0x137   :  { %v259_v33 = vpack.c.bf16 %v258_v32, %v258_v32 }
 0x139   :  { %336 = vmatmul.bf16.vlgmr.msra.gmra.mxu2 %v259_v33 }
 0x13a   :  { %v256_v34 = vpop.f32.mrf.mxu1 }
 0x1bc   :  { %v337_v36 = vpop.f32.mrf.mxu2 }
 0x1bd   :  { %v338_v37 = vadd.f32 %v489_v35, %v337_v36 }
 0x1bf   :  { %341 = vst [vmem:[#allocation11] sm:$0xff] %v338_v37 }
 0x1c0   :  { %352 = dma.vmem_to_hbm [thread:$0]  %s348_s20, 128, %s350_s23, [#allocation5]  }
 0x1c4   :  { %v339_v38 = vpop.f32.mrf.mxu2 }
 0x1c5   :  { %616 = dma.done.wait [#allocation5], 128  }
 0x1c6   :  { %617 = vsyncadd [#allocation5], 4294967168 }
 0x1c7   :  { %357 = vsyncpa [#allocation4], 1 }
 0x1c8   :  { %358 = vsyncpa [#allocation7], 1 }
 0x1c9   :  { %359 = vsyncpa [#allocation10], 1 }
 0x1ca   :  { %360 = vsyncpa [#allocation5], 1 }

</bundles_post_ra>
